<compile_context>
chip_gen: v7x
topology: tpu7x:2x2x1
jax: 0.10.0
libtpu: 0.0.40
codegen_flags: <defaults>
</compile_context>

<pallas_src>
import jax
import jax.numpy as jnp
from jax.experimental import pallas as pl
from jax.experimental.pallas import tpu as pltpu


_TR = 8  # output rows produced per grid step (keeps row-groups sublane-aligned)


def _rotate_kernel(sy_ref, sx_ref, planes_ref, out_ref):
    """Bilinear grid_sample (zeros padding) of a block of planes.

    sy_ref, sx_ref : (1, 1, N) f32   N = _TR*W, flattened source coords of the
                                     _TR output rows handled this step
    planes_ref     : (G, H, W)       block of image planes (shared sampling grid)
    out_ref        : (G, 1, 1, N)    rotated output row-group (row-major flattened)
    """
    G, H, W = planes_ref.shape
    N = sx_ref.shape[-1]                                   # _TR * W

    flat = planes_ref[...].astype(jnp.float32).reshape(G * H, W)   # layout-preserving
    sx = sx_ref[0]                                         # (1, N)
    sy = sy_ref[0]                                         # (1, N)

    # Hat-function interpolation weights built from iotas; out-of-range taps
    # get weight 0, which is exactly grid_sample's padding_mode='zeros'.
    q_idx = jax.lax.broadcasted_iota(jnp.int32, (W, N), 0).astype(jnp.float32)
    p_idx = jax.lax.broadcasted_iota(jnp.int32, (H, N), 0).astype(jnp.float32)
    wx = jnp.maximum(0.0, 1.0 - jnp.abs(sx - q_idx))       # (W, N): wx[q, r*W+j]
    wy = jnp.maximum(0.0, 1.0 - jnp.abs(sy - p_idx))       # (H, N): wy[p, r*W+j]

    # Horizontal interpolation of every source row of every plane at the x
    # positions of ALL _TR output rows: ONE wide MXU matmul per grid step.
    hs = jnp.dot(flat, wx, preferred_element_type=jnp.float32)      # (G*H, N)
    # Vertical interpolation: per-column weighted sum over source rows (VPU).
    rows = jnp.sum(wy[None, :, :] * hs.reshape(G, H, N), axis=1)    # (G, N)
    out_ref[...] = rows[:, None, None, :].astype(out_ref.dtype)


def _sample_maps(H, W, angle_deg):
    """Source coordinates replicating torch diff_rotate (zeros pad, bilinear,
    align_corners=False, expand=False), folded back onto the original canvas."""
    pad_h = (int(2 ** 0.5 * H) - H) // 2 + 1
    pad_w = (int(2 ** 0.5 * W) - W) // 2 + 1
    Hp, Wp = H + 2 * pad_h, W + 2 * pad_w
    ang = angle_deg * (jnp.pi / 180.0)
    cos_a, sin_a = jnp.cos(ang), jnp.sin(ang)
    ly = jnp.linspace(-1.0, 1.0, Hp)[pad_h:pad_h + H]      # cropped output rows
    lx = jnp.linspace(-1.0, 1.0, Wp)[pad_w:pad_w + W]      # cropped output cols
    px = lx[None, :]
    py = ly[:, None]
    mesh_x = px * cos_a - py * sin_a
    mesh_y = px * sin_a + py * cos_a
    # grid_sample unnormalization (align_corners=False) on the padded canvas,
    # then shift back into original-image coordinates (with zeros padding this
    # is exactly equivalent to sampling the padded image and cropping).
    sx = ((mesh_x + 1.0) * Wp - 1.0) * 0.5 - pad_w
    sy = ((mesh_y + 1.0) * Hp - 1.0) * 0.5 - pad_h
    return sy.astype(jnp.float32), sx.astype(jnp.float32)


def _pick_plane_block(n_planes, h, w, max_block_elems=128 * 1024):
    """Largest divisor of n_planes whose (G, H, W) block keeps the dominant
    in-kernel temporary (the (G*H, 8*W) f32 matmul result, ~32*G*H*W bytes)
    well under the scoped-VMEM default, preferring >= 2 plane blocks so the
    'parallel' grid axis can feed both v7x TensorCores."""
    best = 1
    for g in range(1, n_planes + 1):
        if n_planes % g:
            continue
        if g * h * w > max_block_elems:
            break
        if n_planes // g >= 2 or n_planes == 1:
            best = g
    return best
    # TODO(synk): for very large single planes (H*W >> max_block_elems) chunk
    # the horizontal matmul over source rows instead of holding the full plane.


def diff_pair_rotate(x, t, angle_deg):
    """Apply the same differentiable rotation (bilinear, zero fill) to x and t.

    x, t      : (B, C, H, W) arrays of the same shape & dtype.
    angle_deg : scalar rotation angle in degrees (traced or concrete).
    """
    assert x.shape == t.shape and x.dtype == t.dtype
    B, C, H, W = x.shape
    assert H % _TR == 0, "H must be a multiple of 8 (row-group tiling)"

    sy, sx = _sample_maps(H, W, angle_deg)                 # (H, W) each, f32
    N = _TR * W
    RB = H // _TR
    # Flatten row groups into lanes once in the wrapper: no in-kernel relayout,
    # and the coordinate / output blocks become lane-dense.
    sy_f = sy.reshape(RB, 1, N)
    sx_f = sx.reshape(RB, 1, N)

    n_planes = 2 * B * C
    planes = jnp.concatenate([x, t], axis=0).reshape(n_planes, H, W)
    G = _pick_plane_block(n_planes, H, W)
    grid = (n_planes // G, RB)

    out = pl.pallas_call(
        _rotate_kernel,
        out_shape=jax.ShapeDtypeStruct((n_planes, RB, 1, N), x.dtype),
        grid=grid,
        in_specs=[
            pl.BlockSpec((1, 1, N), lambda pb, rb: (rb, 0, 0)),        # sy rows
            pl.BlockSpec((1, 1, N), lambda pb, rb: (rb, 0, 0)),        # sx rows
            pl.BlockSpec((G, H, W), lambda pb, rb: (pb, 0, 0)),        # plane block (resident across rb)
        ],
        out_specs=pl.BlockSpec((G, 1, 1, N), lambda pb, rb: (pb, rb, 0, 0)),
        compiler_params=pltpu.CompilerParams(
            dimension_semantics=("parallel", "arbitrary")),
    )(sy_f, sx_f, planes)

    out = out.reshape(2, B, C, H, W)                       # contiguous reshape (free)
    return out[0], out[1]


def diff_pair_random_rotate(x, t, key, angle=45.0, mode="bilinear",
                            padding_mode="zeros", align_corners=False,
                            expand=False, instance_random=False):
    """Training forward of DiffPairRandomRotate (instance_random=False path).
    Eval mode with expand=False is the identity and needs no kernel."""
    if mode != "bilinear":
        raise NotImplementedError  # TODO(synk): mode='nearest' sampling
    if padding_mode != "zeros":
        raise NotImplementedError  # TODO(synk): 'reflection'/'border' padding modes
    if align_corners:
        raise NotImplementedError  # TODO(synk): align_corners=True unnormalization
    if expand:
        raise NotImplementedError  # TODO(synk): expand=True enlarges the output canvas
    if instance_random:
        raise NotImplementedError  # TODO(synk): per-sample angles (diff_random_rotate_pair)
    # torch: angle = (torch.rand(1).item() * 2 - 1) * self.angle
    ang = jax.random.uniform(key, (), minval=-float(angle), maxval=float(angle))
    out_x, out_t = diff_pair_rotate(x, t, ang)
    return out_x, out_t, ang  # angle returned for testability


def _reference_diff_rotate(x, angle_deg):
    """Pure-JAX replica of torch diff_rotate: zero pad -> rotation grid ->
    grid_sample(bilinear, padding_mode='zeros', align_corners=False) -> crop."""
    B, C, H, W = x.shape
    pad_h = (int(2 ** 0.5 * H) - H) // 2 + 1
    pad_w = (int(2 ** 0.5 * W) - W) // 2 + 1
    Hp, Wp = H + 2 * pad_h, W + 2 * pad_w
    xp = jnp.pad(x, ((0, 0), (0, 0), (pad_h, pad_h), (pad_w, pad_w)))
    ang = angle_deg * (jnp.pi / 180.0)
    cos_a, sin_a = jnp.cos(ang), jnp.sin(ang)
    py, px = jnp.meshgrid(jnp.linspace(-1.0, 1.0, Hp),
                          jnp.linspace(-1.0, 1.0, Wp), indexing="ij")
    gx = px * cos_a - py * sin_a
    gy = px * sin_a + py * cos_a
    sx = ((gx + 1.0) * Wp - 1.0) * 0.5
    sy = ((gy + 1.0) * Hp - 1.0) * 0.5
    x0 = jnp.floor(sx).astype(jnp.int32)
    y0 = jnp.floor(sy).astype(jnp.int32)
    fx = sx - jnp.floor(sx)
    fy = sy - jnp.floor(sy)

    def tap(yy, xx, w):
        valid = (yy >= 0) & (yy < Hp) & (xx >= 0) & (xx < Wp)
        v = xp[:, :, jnp.clip(yy, 0, Hp - 1), jnp.clip(xx, 0, Wp - 1)]
        return jnp.where(valid, v, 0.0) * w

    outp = (tap(y0, x0, (1.0 - fy) * (1.0 - fx))
            + tap(y0, x0 + 1, (1.0 - fy) * fx)
            + tap(y0 + 1, x0, fy * (1.0 - fx))
            + tap(y0 + 1, x0 + 1, fy * fx))
    return outp[:, :, pad_h:pad_h + H, pad_w:pad_w + W]


if __name__ == "__main__":
    key = jax.random.PRNGKey(0)
    kx, kt, ka = jax.random.split(key, 3)
    B, C, H, W = 2, 4, 16, 16
    x = jax.random.normal(kx, (B, C, H, W), dtype=jnp.float32)
    t = jax.random.normal(kt, (B, C, H, W), dtype=jnp.float32)

    out_x, out_t, angle = diff_pair_random_rotate(x, t, ka, angle=45.0)
    jax.block_until_ready((out_x, out_t))

    ref_x = _reference_diff_rotate(x, angle)
    ref_t = _reference_diff_rotate(t, angle)
    # Tolerance covers the MXU's reduced-precision f32 matmul passes; an
    # indexing / rotation bug would produce O(1) mismatches.
    assert bool(jnp.allclose(out_x, ref_x, atol=2e-2, rtol=2e-2)), "input rotate mismatch"
    assert bool(jnp.allclose(out_t, ref_t, atol=2e-2, rtol=2e-2)), "target rotate mismatch"
    print("KERNEL_OK")
</pallas_src>

<mosaic_0001>
module attributes {stable_mosaic.version = 11 : i64} {
  func.func @_rotate_kernel(%arg0: i32, %arg1: i32, %arg2: memref<1x1x128xf32, #tpu.memory_space<vmem>>, %arg3: memref<1x1x128xf32, #tpu.memory_space<vmem>>, %arg4: memref<8x16x16xf32, #tpu.memory_space<vmem>>, %arg5: memref<8x1x1x128xf32, #tpu.memory_space<vmem>>) attributes {dimension_semantics = [#tpu.dimension_semantics<parallel>, #tpu.dimension_semantics<arbitrary>], iteration_bounds = array<i64: 2, 2>, scalar_prefetch = 0 : i64, scratch_operands = 0 : i64, tpu.core_type = #tpu.core_type<tc>, window_params = [{transform_indices = @transform_0, window_bounds = array<i64: 1, 1, 128>}, {transform_indices = @transform_1, window_bounds = array<i64: 1, 1, 128>}, {transform_indices = @transform_2, window_bounds = array<i64: 8, 16, 16>}, {transform_indices = @transform_3, window_bounds = array<i64: 8, 1, 1, 128>}]} {
    %c0 = arith.constant 0 : index
    %c0_0 = arith.constant 0 : index
    %c0_1 = arith.constant 0 : index
    %0 = vector.load %arg4[%c0, %c0_0, %c0_1] : memref<8x16x16xf32, #tpu.memory_space<vmem>>, vector<8x16x16xf32>
    %1 = vector.shape_cast %0 : vector<8x16x16xf32> to vector<128x16xf32>
    %c0_2 = arith.constant 0 : index
    %c0_3 = arith.constant 0 : index
    %c0_4 = arith.constant 0 : index
    %2 = vector.load %arg3[%c0_2, %c0_3, %c0_4] : memref<1x1x128xf32, #tpu.memory_space<vmem>>, vector<1x1x128xf32>
    %3 = vector.shape_cast %2 : vector<1x1x128xf32> to vector<1x128xf32>
    %c0_5 = arith.constant 0 : index
    %c0_6 = arith.constant 0 : index
    %c0_7 = arith.constant 0 : index
    %4 = vector.load %arg2[%c0_5, %c0_6, %c0_7] : memref<1x1x128xf32, #tpu.memory_space<vmem>>, vector<1x1x128xf32>
    %5 = vector.shape_cast %4 : vector<1x1x128xf32> to vector<1x128xf32>
    %6 = tpu.iota {dimensions = array<i32: 0>} : vector<16x128xi32>
    %7 = arith.sitofp %6 : vector<16x128xi32> to vector<16x128xf32>
    %8 = tpu.iota {dimensions = array<i32: 0>} : vector<16x128xi32>
    %9 = arith.sitofp %8 : vector<16x128xi32> to vector<16x128xf32>
    %10 = vector.broadcast %3 : vector<1x128xf32> to vector<16x128xf32>
    %11 = arith.subf %10, %7 : vector<16x128xf32>
    %12 = math.absf %11 : vector<16x128xf32>
    %cst = arith.constant 1.000000e+00 : f32
    %13 = vector.broadcast %cst : f32 to vector<16x128xf32>
    %14 = arith.subf %13, %12 : vector<16x128xf32>
    %cst_8 = arith.constant 0.000000e+00 : f32
    %15 = vector.broadcast %cst_8 : f32 to vector<16x128xf32>
    %16 = arith.maximumf %15, %14 : vector<16x128xf32>
    %17 = vector.broadcast %5 : vector<1x128xf32> to vector<16x128xf32>
    %18 = arith.subf %17, %9 : vector<16x128xf32>
    %19 = math.absf %18 : vector<16x128xf32>
    %cst_9 = arith.constant 1.000000e+00 : f32
    %20 = vector.broadcast %cst_9 : f32 to vector<16x128xf32>
    %21 = arith.subf %20, %19 : vector<16x128xf32>
    %cst_10 = arith.constant 0.000000e+00 : f32
    %22 = vector.broadcast %cst_10 : f32 to vector<16x128xf32>
    %23 = arith.maximumf %22, %21 : vector<16x128xf32>
    %cst_11 = arith.constant dense<0.000000e+00> : vector<128x128xf32>
    %24 = tpu.matmul %1, %16, %cst_11 {dimension_numbers = #tpu.dot_dimension_numbers<[1], [0], [0], [1], [0, 0, 1, 1], [], []>} : vector<128x16xf32>, vector<16x128xf32>, vector<128x128xf32> -> vector<128x128xf32>
    %25 = vector.shape_cast %23 : vector<16x128xf32> to vector<1x16x128xf32>
    %26 = vector.shape_cast %24 : vector<128x128xf32> to vector<8x16x128xf32>
    %27 = vector.broadcast %25 : vector<1x16x128xf32> to vector<8x16x128xf32>
    %28 = arith.mulf %27, %26 : vector<8x16x128xf32>
    %cst_12 = arith.constant dense<0.000000e+00> : vector<8x128xf32>
    %29 = vector.multi_reduction <add>, %28, %cst_12 [1] : vector<8x16x128xf32> to vector<8x128xf32>
    %30 = vector.shape_cast %29 : vector<8x128xf32> to vector<8x1x1x128xf32>
    %c0_13 = arith.constant 0 : index
    %c0_14 = arith.constant 0 : index
    %c0_15 = arith.constant 0 : index
    %c0_16 = arith.constant 0 : index
    %31 = vector.load %arg5[%c0_13, %c0_14, %c0_15, %c0_16] : memref<8x1x1x128xf32, #tpu.memory_space<vmem>>, vector<8x1x1x128xf32>
    tpu.vector_store %arg5[%c0_13, %c0_14, %c0_15, %c0_16], %30 {strides = array<i32>} : memref<8x1x1x128xf32, #tpu.memory_space<vmem>>, vector<8x1x1x128xf32>,
    return
  }
  func.func @transform_0(%arg0: i32, %arg1: i32) -> (i32, i32, i32) {
    %c0_i32 = arith.constant 0 : i32
    %c0_i32_0 = arith.constant 0 : i32
    %c0_i32_1 = arith.constant 0 : i32
    return %arg1, %c0_i32, %c0_i32_0 : i32, i32, i32
  }
  func.func @transform_1(%arg0: i32, %arg1: i32) -> (i32, i32, i32) {
    %c0_i32 = arith.constant 0 : i32
    %c0_i32_0 = arith.constant 0 : i32
    %c0_i32_1 = arith.constant 0 : i32
    return %arg1, %c0_i32, %c0_i32_0 : i32, i32, i32
  }
  func.func @transform_2(%arg0: i32, %arg1: i32) -> (i32, i32, i32) {
    %c0_i32 = arith.constant 0 : i32
    %c0_i32_0 = arith.constant 0 : i32
    %c0_i32_1 = arith.constant 0 : i32
    return %arg0, %c0_i32, %c0_i32_0 : i32, i32, i32
  }
  func.func @transform_3(%arg0: i32, %arg1: i32) -> (i32, i32, i32, i32) {
    %c0_i32 = arith.constant 0 : i32
    %c0_i32_0 = arith.constant 0 : i32
    %c0_i32_1 = arith.constant 0 : i32
    return %arg0, %arg1, %c0_i32, %c0_i32_0 : i32, i32, i32, i32
  }
}

</mosaic_0001>

<bundles_post_ra>
// kernel: tpu_custom_call.1
= control target key start
LH: loop header
LB: loop body
LE: loop exit
PB: predicated region body
PF: predicated region fallthrough
CT: control target
= control target key end

     0   :  { %s1565_s0 = inlined_call_operand.hbm [shape: f32[2,1,128], index: 0, kind: input, shape index: {}]   ;;  %s1566_s1 = inlined_call_operand.vmem [shape: f32[2,1,128], index: 1, kind: input, shape index: {}]   ;;  %s1567_s2 = inlined_call_operand.hbm [shape: f32[16,16,16], index: 2, kind: input, shape index: {}]   ;;  %s1568_s3 = inlined_call_operand.hbm [shape: f32[16,2,1,128], index: 3, kind: output, shape index: {}]  }
   0x1   :  { %1577 = sst [smem:[#allocation18_spill]] %s1565_s0 }
   0x2   :  { %8 = vsyncpa [#allocation3], 0 }
   0x3   :  { %10 = vsyncpa [#allocation3 + $0x1], 0 }
   0x4   :  { %11 = vsyncpa [#allocation6], 0 }
   0x5   :  { %13 = vsyncpa [#allocation6 + $0x1], 0 }
   0x6   :  { %14 = vsyncpa [#allocation4], 0 }
   0x7   :  { %16 = vsyncpa [#allocation4 + $0x1], 0  ;;  %s1177_s12 = smov 0   ;;  %s1179_s13 = smov 0  }
   0x8   :  { %s1181_s14 = smov 0   ;;  %s1183_s15 = smov 0  }
   0x9   :  { %s1185_s16 = smov 0   ;;  %s1187_s17 = smov 0  }
   0xa   :  { %s1189_s18 = smov 0   ;;  %s1191_s19 = smov 0  }
   0xb   :  { %s1193_s20 = smov 0   ;;  %s1195_s21 = smov 0  }
   0xc   :  { %s1197_s22 = smov 0   ;;  %s1199_s23 = smov 0  }
   0xd   :  { %s1201_s24 = smov 0   ;;  %s1203_s25 = smov 0  }
   0xe LB: > { %1578 = sst [smem:[#allocation11_spill]] %s1127_s20  ;;  %s710_s26 = sadd.s32 4294967295, %s1147_s25   ;;  %s1147_s25 = sphi %s1203_s25, %s22_s25   ;;  %s1143_s24 = sphi %s1201_s24, %s1609_s24   ;;  %s1139_s23 = sphi %s1199_s23, %s1608_s23   ;;  %s1135_s22 = sphi %s1197_s22, %s1607_s22   ;;  %s1131_s21 = sphi %s1195_s21, %s1606_s21   ;;  %s1127_s20 = sphi %s1193_s20, %s1605_s20   ;;  %s1123_s19 = sphi %s1191_s19, %s1617_s19   ;;  %s1119_s18 = sphi %s1189_s18, %s1616_s18   ;;  %s1115_s17 = sphi %s1187_s17, %s1615_s17   ;;  %s1111_s16 = sphi %s1185_s16, %s1614_s16   ;;  %s1107_s15 = sphi %s1183_s15, %s1613_s15   ;;  %s1103_s14 = sphi %s1181_s14, %s1612_s14   ;;  %s1099_s13 = sphi %s1179_s13, %s1611_s13   ;;  %s1095_s12 = sphi %s1177_s12, %s1610_s12  }
   0xf   : > { %1579 = sst [smem:[#allocation12_spill]] %s1139_s23  ;;  %s31_s28 = sadd.s32 1, %s1139_s23 }
  0x10   : > { %1580 = sst [smem:[#allocation13_spill]] %s1143_s24  ;;  %s34_s29 = sadd.s32 1, %s1143_s24 }
  0x11   : > { %p32_p0 = scmp.ge.s32.totalorder %s31_s28, 2  ;;  %s41_s30 = sadd.s32 1, %s1127_s20 }
  0x12   : > { %p48_p1 = scmp.ne.s32.totalorder %s1127_s20, %s1123_s19  ;;  %p49_p2 = scmp.eq.s32.totalorder %s1147_s25, 0 }
  0x13   : > { %s1619_s28 = smov (%p32_p0, %s31_s28), 0  ;;  %s1621_s29 = smov (!%p32_p0, %s34_s29), %s1143_s24 }
  0x14   : > { %1581 = sst [smem:[#allocation14_spill]] %s1619_s28  ;;  %s38_s4 = ssub.s32 %s1139_s23, %s1619_s28 }
  0x15   : > { %p1260_p3 = por %p49_p2, %p48_p1  ;;  %p36_p4 = scmp.ge.s32.totalorder %s1621_s29, 2 }
  0x16   : > { %p39_p5 = scmp.eq.s32.totalorder %s38_s4, 0  ;;  %p54_p6 = scmp.ne.s32.totalorder %s1123_s19, %s1119_s18 }
  0x17   : > { %p55_p7 = scmp.eq.s32.totalorder %s710_s26, 0  ;;  %s1623_s29 = smov (%p36_p4, %s1621_s29), 0 }
  0x18   : > { %1583 = sst [smem:[#allocation15_spill]] %s1623_s29  ;;  %s90_s8 = ssub.s32 %s1143_s24, %s1623_s29 }
  0x19   : > { %s1270_s6 = scalar_select %p39_p5, %s1127_s20, %s41_s30  }
  0x1a   : > { %p1272_p8 = por %p55_p7, %p54_p6  ;;  %p91_p9 = scmp.eq.s32.totalorder %s90_s8, 0 }
  0x1b   : > { %1584 = sst [smem:[#allocation16_spill]] %s1270_s6  ;;  %s93_s9 = sadd.s32 1, %s1115_s17 }
  0x1c   : > { %s1585_s7 = scalar_select %p1272_p8, 1, 0 }
  0x1d   : > { %p100_p10 = scmp.ne.s32.totalorder %s1115_s17, %s1111_s16  ;;  %p106_p11 = scmp.ne.s32.totalorder %s1111_s16, %s1107_s15 }
  0x1e   : > { %s1284_s10 = scalar_select %p91_p9, %s1115_s17, %s93_s9  }
  0x1f   : > { %p1288_p12 = por %p100_p10, %p49_p2  ;;  %p1292_p13 = por %p106_p11, %p55_p7 }
  0x20   : > { %1586 = sst [smem:[#allocation17_spill]] %s1284_s10  ;;  %s118_s30 = sor.u32 %s90_s8, %s38_s4 }
  0x21   : > { %s1588_s18 = scalar_select %p1292_p13, 1, 0 }
  0x22   : > { %s121_s27 = sadd.s32 1, %s1103_s14  ;;  %p119_p0 = scmp.eq.s32.totalorder %s118_s30, 0 }
  0x23   : > { %p131_p1 = scmp.ne.s32.totalorder %s1103_s14, %s1099_s13  ;;  %p132_p4 = scmp.eq.s32.totalorder %s710_s26, 3 }
  0x24   : > { %p137_p5 = scmp.ne.s32.totalorder %s1099_s13, %s1095_s12  ;;  %s1590_s29 = sadd.s32 4294967294, %s1147_s25  }
  0x25   : > { %s1304_s15 = scalar_select %p119_p0, %s1103_s14, %s121_s27  }
  0x26   : > { %p1306_p2 = por %p132_p4, %p131_p1  ;;  %p138_p6 = scmp.eq.s32.totalorder %s1590_s29, 3 }
  0x27   : > { %p818_p7 = scmp.lt.s32.totalorder %s1147_s25, 4  ;;  %s158_s8 = sand.u32 1, %s1127_s20  }
  0x28   : > { %s1589_s9 = scalar_select %p1306_p2, 1, 0 }
  0x29   : > { %p1313_p9 = por %p138_p6, %p137_p5  ;;  %s714_s30 = sshll.u32 %s1139_s23, 4 }
  0x2a   : > { %s161_s28 = scalar_lea.vmem [#allocation2], %s158_s8  ;;  %s1592_s0 = sld [smem:[#allocation18_spill]] }
  0x2b   : > { %s1591_s4 = scalar_select %p1313_p9, 1, 0 }
  0x2c   : > { %s168_s6 = sshll.u32 %s161_s28, 4  ;;  %p1328_p10 = pnand %p818_p7, %p1260_p3  ;;  %s1324_s6 = int_to_ptr.vmem [resolvable:$true] %s168_s6 }
  0x2d   : > { %p1334_p11 = pnand %p818_p7, %p1288_p12  ;;  %s159_s10 = scalar_lea.sflag [#allocation3], %s158_s8 }
  0x2e   : > { %p939_p5 = pneg %p1328_p10 }
  0x30   : > { %s1322_s27 = scalar_lea.hbm %s1592_s0, %s714_s30  ;;  %s942_s11 = scalar_lea.hbm %s1592_s0, 32 }
  0x31   : > { %s937_s30 = scalar_lea.hbm %s1322_s27, 16  ;;  %p943_p12 = scmp.lt.u32.totalorder %s1322_s27, %s1592_s0 }
  0x32   : > { %p938_p4 = scmp.ne.s32.totalorder %s1322_s27, %s937_s30  ;;  %p944_p7 = scmp.lt.u32.totalorder %s942_s11, %s937_s30 }
  0x33   : > { %p946_p1 = scmp.lt.u32.totalorder %s937_s30, %s1322_s27 }
  0x34   : > { %p940_p3 = pnand %p939_p5, %p938_p4  ;;  %p945_p0 = por %p944_p7, %p943_p12 }
  0x36   : > { %p941_p6 = pneg %p940_p3  ;;  %p947_p9 = por %p946_p1, %p945_p0 }
  0x38   : > { %p948_p2 = pnand %p947_p9, %p941_p6 }
  0x3a   : > { %951 = shalt.err (!%p948_p2)
}
  0x3b   : > { %s952_s8 = scalar_lea.vmem %s1324_s6, 16  ;;  %s1149_s5 = smov [#allocation2]  }
  0x3c   : > { %p953_p4 = scmp.ne.s32.totalorder %s1324_s6, %s952_s8  ;;  %s957_s26 = sshll.u32 %s1149_s5, 4  ;;  %s958_s26 = int_to_ptr.vmem [resolvable:$false] %s957_s26 }
  0x3d   : > { %s959_s20 = scalar_lea.vmem %s958_s26, 32  ;;  %p960_p8 = scmp.lt.s32.totalorder %s1324_s6, %s958_s26 }
  0x3e   : > { %p955_p3 = pnand %p953_p4, %p939_p5  ;;  %p961_p12 = scmp.lt.s32.totalorder %s959_s20, %s952_s8 }
  0x40   : > { %p956_p13 = pneg %p955_p3  ;;  %p962_p7 = por %p961_p12, %p960_p8 }
  0x42   : > { %p963_p0 = pnand %p962_p7, %p956_p13 }
  0x44   : > { %966 = shalt.err (!%p963_p0)
}
  0x45   : > { %810 = dma.hbm_to_vmem [thread:$0]  (!%p1328_p10), %s1322_s27, 16, %s1324_s6, %s159_s10  }
  0x46   : > { %p1595_p2 = scmp.lt.s32.totalorder %s1147_s25, 5  ;;  %p1596_p9 = scmp.ge.s32.totalorder %s1147_s25, 1 }
  0x47   : > { %s181_s30 = sand.u32 1, %s1115_s17   ;;  %s747_s8 = sshll.u32 %s1143_s24, 11 }
  0x48   : > { %p1369_p1 = pnand %p1596_p9, %p1595_p2  ;;  %s715_s11 = sshll.u32 %s181_s30, 7 }
  0x49   : > { %s1378_s26 = scalar_lea.hbm %s1567_s2, %s747_s8  ;;  %s185_s20 = scalar_lea.vmem [#allocation5], %s715_s11 }
  0x4a   : > { %s193_s6 = sshll.u32 %s185_s20, 4  ;;  %s1382_s27 = scalar_lea.sflag [#allocation6], %s181_s30  ;;  %s1380_s6 = int_to_ptr.vmem [resolvable:$true] %s193_s6 }
  0x4b   : > { %s967_s10 = scalar_lea.hbm %s1378_s26, 2048  ;;  %p969_p13 = pneg %p1334_p11 }
  0x4c   : > { %p968_p8 = scmp.ne.s32.totalorder %s1378_s26, %s967_s10  ;;  %s972_s29 = scalar_lea.hbm %s1567_s2, 4096 }
  0x4d   : > { %p973_p6 = scmp.lt.u32.totalorder %s1378_s26, %s1567_s2  ;;  %p974_p4 = scmp.lt.u32.totalorder %s972_s29, %s967_s10 }
  0x4e   : > { %p970_p10 = pnand %p969_p13, %p968_p8  ;;  %p976_p12 = scmp.lt.u32.totalorder %s967_s10, %s1378_s26 }
  0x4f   : > { %p975_p3 = por %p974_p4, %p973_p6 }
  0x50   : > { %p971_p5 = pneg %p970_p10 }
  0x51   : > { %p977_p7 = por %p976_p12, %p975_p3 }
  0x53   : > { %p978_p0 = pnand %p977_p7, %p971_p5 }
  0x55   : > { %981 = shalt.err (!%p978_p0)
}
  0x56   : > { %s982_s30 = scalar_lea.vmem %s1380_s6, 2048  ;;  %s1150_s11 = smov [#allocation5]  }
  0x57   : > { %p983_p2 = scmp.ne.s32.totalorder %s1380_s6, %s982_s30  ;;  %s987_s20 = sshll.u32 %s1150_s11, 4  ;;  %s988_s20 = int_to_ptr.vmem [resolvable:$false] %s987_s20 }
  0x58   : > { %s989_s0 = scalar_lea.vmem %s988_s20, 4096  ;;  %p990_p10 = scmp.lt.s32.totalorder %s1380_s6, %s988_s20 }
  0x59   : > { %p985_p9 = pnand %p983_p2, %p969_p13  ;;  %p991_p6 = scmp.lt.s32.totalorder %s989_s0, %s982_s30 }
  0x5b   : > { %p986_p8 = pneg %p985_p9  ;;  %p992_p4 = por %p991_p6, %p990_p10 }
  0x5d   : > { %p993_p3 = pnand %p992_p4, %p986_p8 }
  0x5f   : > { %996 = shalt.err (!%p993_p3)
}
  0x60   : > { %s1151_s24 = smov 128   ;;  %s1152_s10 = smov 8  }
  0x61   : > { %813 = dma.hbm_to_vmem [thread:$0]  (!%p1334_p11), %s1378_s26, 2048, %s1380_s6, %s1382_s27, %s1151_s24, %s1151_s24, %s1152_s10  }
  0x62   : > { %205 = sbr.rel (%p1369_p1) target bundleno = 390 (0x186), region = 32  ;;  %s207_s8 = sand.u32 (!%p1369_p1), 1, %s1123_s19  }
  0x63   : > { %s208_s5 = scalar_lea.sflag (!%p1369_p1), [#allocation3], %s207_s8  ;;  %s1413_s29 = scalar_lea.vmem (!%p1369_p1), [#allocation2], %s207_s8 }
  0x64   : > { %p1598_p13 = scmp.ne.s32.totalorder (!%p1369_p1), %s1585_s7, 0 }
  0x69   : > { %1082 = dma.done.wait (%p1598_p13), %s208_s5, 16  }
  0x6a   : > { %1084 = vsyncadd (%p1598_p13), %s208_s5, 4294967280  ;;  %s215_s30 = sand.u32 1, %s1111_s16   ;;  %p1599_p11 = scmp.ne.s32.totalorder %s1588_s18, 0 }
  0x6b   : > { %s720_s11 = sshll.u32 %s215_s30, 7  ;;  %s216_s28 = scalar_lea.sflag [#allocation6], %s215_s30 }
  0x6c   : > { %s1420_s26 = scalar_lea.vmem [#allocation5], %s720_s11 }
  0x6d   : > { %1086 = dma.done.wait (%p1599_p11), %s216_s28, 2048  }
  0x6e   : > { %1088 = vsyncadd (%p1599_p11), %s216_s28, 4294965248  ;;  %p249_p1 = scmp.lt.s32.totalorder %s1131_s21, 1  ;;  %v272_v0 = vlaneseq  ;;  %vm305_vm0 = vcmask 130048   ;;  %v254_v6 = vld [vmem:[%s1420_s26] sm:$0xff]  ;;  %v255_v17 = vld [vmem:[%s1420_s26 + $0x8] sm:$0xff]  ;;  %s246_s18 = sand.u32 1, %s1099_s13  }
  0x6f   : > { %771 = vmatprep.mubr.msk.f32.mxu0 %vm305_vm0, %v254_v6  ;;  %v262_v9 = vld [vmem:[%s1420_s26 + $0x40] sm:$0xff]  ;;  %v263_v18 = vld [vmem:[%s1420_s26 + $0x48] sm:$0xff]  ;;  %v256_v19 = vld [vmem:[%s1420_s26 + $0x10] sm:$0xff]  ;;  %s721_s20 = sshll.u32 %s246_s18, 3  ;;  %s748_s24 = sshll.u32 %s1135_s22, 4 }
  0x70   : > { %s250_s7 = scalar_select %p249_p1, %s1131_s21, 1  ;;  %v273_v1 = vshrl.u32 %v272_v0, 7  ;;  %783 = vmatprep.mubr.msk.f32.mxu1 %vm305_vm0, %v262_v9  ;;  %v264_v20 = vld [vmem:[%s1420_s26 + $0x50] sm:$0xff]  ;;  %v257_v21 = vld [vmem:[%s1420_s26 + $0x18] sm:$0xff]  ;;  %v258_v23 = vld [vmem:[%s1420_s26 + $0x20] sm:$0xff] }
  0x71   : > { %v265_v22 = vld [vmem:[%s1420_s26 + $0x58] sm:$0xff]  ;;  %v266_v24 = vld [vmem:[%s1420_s26 + $0x60] sm:$0xff]  ;;  %v259_v25 = vld [vmem:[%s1420_s26 + $0x28] sm:$0xff]  ;;  %s1467_s0 = scalar_lea.vmem [#allocation7], %s721_s20  ;;  %s592_s10 = sadd.s32 %s1131_s21, %s748_s24 }
  0x72   : > { %s251_s27 = scalar_lea.vmem %s1566_s1, %s250_s7  ;;  %v274_v2 = vadd.s32 8, %v273_v1  ;;  %v275_v3 = vcvt.s32.f32 %v273_v1  ;;  %v267_v26 = vld [vmem:[%s1420_s26 + $0x68] sm:$0xff]  ;;  %v260_v27 = vld [vmem:[%s1420_s26 + $0x30] sm:$0xff]  ;;  %v261_v29 = vld [vmem:[%s1420_s26 + $0x38] sm:$0xff]  ;;  %s595_s8 = sshll.u32 %s1467_s0, 4  ;;  %s1476_s8 = int_to_ptr.vmem [resolvable:$true] %s595_s8 }
  0x73   : > { %v722_v5 = vld [vmem:[%s251_s27] ss:$0 sm:$0xff]  ;;  %v268_v28 = vld [vmem:[%s1420_s26 + $0x70] sm:$0xff]  ;;  %s743_s22 = sshll.u32 %s592_s10, 4  ;;  %s1489_s30 = scalar_lea.sflag [#allocation4], %s246_s18 }
  0x74   : > { %v276_v4 = vcvt.s32.f32 %v274_v2  ;;  %v283_v7 = vsub.f32 %v722_v5, %v275_v3  ;;  %v269_v30 = vld [vmem:[%s1420_s26 + $0x78] sm:$0xff]  ;;  %s997_s11 = scalar_lea.vmem %s1476_s8, 128  ;;  %p1600_p12 = scmp.ne.s32.totalorder %s1589_s9, 0 }
  0x75   : > { %v723_v31 = vld [vmem:[%s1413_s29] ss:$0 sm:$0xff]  ;;  %s1483_s29 = scalar_lea.hbm %s1568_s3, %s743_s22  ;;  %p998_p5 = scmp.ne.s32.totalorder %s1476_s8, %s997_s11 }
  0x76   : > { %v284_v8 = vsub.f32 %v722_v5, %v276_v4  ;;  %v285_v10 = vand.u32 2147483647, %v283_v7  ;;  %v298_v32 = vsub.f32 %v723_v31, %v276_v4  ;;  %v297_v33 = vsub.f32 %v723_v31, %v275_v3  ;;  %s1153_s28 = smov [#allocation7]  }
  0x77   : > { %p999_p7 = pnand %p998_p5, %p1600_p12  ;;  %s1001_s26 = sshll.u32 %s1153_s28, 4  ;;  %s1002_s26 = int_to_ptr.vmem [resolvable:$false] %s1001_s26 }
  0x78   : > { %v286_v11 = vand.u32 2147483647, %v284_v8  ;;  %v287_v12 = vsub.f32 1.0, %v285_v10  ;;  %v300_v34 = vand.u32 2147483647, %v298_v32  ;;  %s1003_s7 = scalar_lea.vmem %s1002_s26, 256  ;;  %p1004_p2 = scmp.lt.s32.totalorder %s1476_s8, %s1002_s26 }
  0x79   : > { %v299_v35 = vand.u32 2147483647, %v297_v33  ;;  %p1000_p0 = pneg %p999_p7  ;;  %p1005_p9 = scmp.lt.s32.totalorder %s1003_s7, %s997_s11 }
  0x7a   : > { %v288_v13 = vsub.f32 1.0, %v286_v11  ;;  %v289_v14 = vmax.f32 %v287_v12, 0.0  ;;  %v302_v36 = vsub.f32 1.0, %v300_v34 }
  0x7b   : > { %v301_v37 = vsub.f32 1.0, %v299_v35  ;;  %p1006_p8 = por %p1005_p9, %p1004_p2 }
  0x7c   : > { %v290_v15 = vmax.f32 %v288_v13, 0.0  ;;  %v304_v38 = vmax.f32 %v302_v36, 0.0 }
  0x7d   : > { %v303_v39 = vmax.f32 %v301_v37, 0.0  ;;  %p1007_p10 = pnand %p1006_p8, %p1000_p0 }
  0x7e   : > { %v795_v16 = vpack.c.bf16 %v290_v15, %v289_v14 }
  0x80   : > { %796 = vmatprep.subr.bf16.mxu0 %v795_v16  ;;  %799 = vmatprep.subr.bf16.mxu1 %v795_v16 }
  0x81   : > { %798 = vmatpush3.bf16.msra.mxu0 %v795_v16  ;;  %800 = vmatpush3.bf16.msra.mxu1 %v795_v16 }
  0x84   : > { %772 = vmatmul.mubr.msk.f32.vlgmr.msra.gmra.mrb[0].mxu0 %vm305_vm0, %v255_v17  ;;  %784 = vmatmul.mubr.msk.f32.vlgmr.msra.gmra.mrb[0].mxu1 %vm305_vm0, %v263_v18 }
  0x85   : > { %774 = vmatprep.mubr.msk.f32.mxu0 %vm305_vm0, %v256_v19  ;;  %786 = vmatprep.mubr.msk.f32.mxu1 %vm305_vm0, %v264_v20 }
  0x88   : > { %775 = vmatmul.mubr.msk.f32.gmra.mrb[2].mxu0 %vm305_vm0, %v257_v21  ;;  %787 = vmatmul.mubr.msk.f32.gmra.mrb[2].mxu1 %vm305_vm0, %v265_v22 }
  0x89   : > { %777 = vmatprep.mubr.msk.f32.mxu0 %vm305_vm0, %v258_v23  ;;  %789 = vmatprep.mubr.msk.f32.mxu1 %vm305_vm0, %v266_v24 }
  0x8c   : > { %778 = vmatmul.mubr.msk.f32.gmra.mrb[4].mxu0 %vm305_vm0, %v259_v25  ;;  %790 = vmatmul.mubr.msk.f32.gmra.mrb[4].mxu1 %vm305_vm0, %v267_v26 }
  0x8d   : > { %780 = vmatprep.mubr.msk.f32.mxu0 %vm305_vm0, %v260_v27  ;;  %792 = vmatprep.mubr.msk.f32.mxu1 %vm305_vm0, %v268_v28 }
  0x90   : > { %781 = vmatmul.mubr.msk.f32.gmra.mrb[6].mxu0 %vm305_vm0, %v261_v29  ;;  %793 = vmatmul.mubr.msk.f32.gmra.mrb[6].mxu1 %vm305_vm0, %v269_v30 }
 0x157   : > { %v773_v40 = vpop.f32.mrb[0].mxu0  ;;  %v785_v41 = vpop.f32.mrb[0].mxu1 }
 0x158   : > { %v500_v42 = vmul.f32 %v773_v40, %v304_v38  ;;  %v508_v43 = vmul.f32 %v785_v41, %v304_v38  ;;  %v420_v44 = vpop.f32.mrb[1].mxu0  ;;  %v460_v45 = vpop.f32.mrb[1].mxu1 }
 0x159   : > { %v499_v46 = vmul.f32 %v420_v44, %v303_v39  ;;  %v507_v47 = vmul.f32 %v460_v45, %v303_v39 }
 0x15b   : > { %v515_v48 = vadd.f32 %v500_v42, %v499_v46  ;;  %v543_v49 = vadd.f32 %v508_v43, %v507_v47  ;;  %v776_v50 = vpop.f32.mrb[2].mxu0  ;;  %v788_v51 = vpop.f32.mrb[2].mxu1 }
 0x15c   : > { %v502_v52 = vmul.f32 %v776_v50, %v304_v38  ;;  %v510_v53 = vmul.f32 %v788_v51, %v304_v38  ;;  %v430_v54 = vpop.f32.mrb[3].mxu0  ;;  %v470_v55 = vpop.f32.mrb[3].mxu1 }
 0x15d   : > { %v516_v56 = vrot.slane %v515_v48, 4  ;;  %v544_v57 = vrot.slane %v543_v49, 4  ;;  %v501_v58 = vmul.f32 %v430_v54, %v303_v39  ;;  %v509_v59 = vmul.f32 %v470_v55, %v303_v39 }
 0x15f   : > { %v517_v60 = vadd.f32 %v516_v56, %v515_v48  ;;  %v545_v61 = vadd.f32 %v544_v57, %v543_v49  ;;  %v522_v62 = vadd.f32 %v502_v52, %v501_v58  ;;  %v550_v63 = vadd.f32 %v510_v53, %v509_v59  ;;  %v779_v0 = vpop.f32.mrb[4].mxu0  ;;  %v791_v1 = vpop.f32.mrb[4].mxu1 }
 0x160   : > { %v504_v2 = vmul.f32 %v779_v0, %v304_v38  ;;  %v512_v3 = vmul.f32 %v791_v1, %v304_v38  ;;  %v440_v4 = vpop.f32.mrb[5].mxu0  ;;  %v480_v5 = vpop.f32.mrb[5].mxu1 }
 0x161   : > { %v518_v6 = vrot.slane %v517_v60, 2  ;;  %v546_v7 = vrot.slane %v545_v61, 2  ;;  %v523_v8 = vrot.slane %v522_v62, 4  ;;  %v551_v9 = vrot.slane %v550_v63, 4 }
 0x162   : > { %v503_v10 = vmul.f32 %v440_v4, %v303_v39  ;;  %v511_v11 = vmul.f32 %v480_v5, %v303_v39 }
 0x163   : > { %v519_v12 = vadd.f32 %v518_v6, %v517_v60  ;;  %v547_v13 = vadd.f32 %v546_v7, %v545_v61  ;;  %v524_v14 = vadd.f32 %v523_v8, %v522_v62  ;;  %v552_v15 = vadd.f32 %v551_v9, %v550_v63  ;;  %v782_v16 = vpop.f32.mrb[6].mxu0  ;;  %v794_v17 = vpop.f32.mrb[6].mxu1 }
 0x164   : > { %v529_v18 = vadd.f32 %v504_v2, %v503_v10  ;;  %v557_v19 = vadd.f32 %v512_v3, %v511_v11  ;;  %v506_v20 = vmul.f32 %v782_v16, %v304_v38  ;;  %v514_v21 = vmul.f32 %v794_v17, %v304_v38  ;;  %v450_v22 = vpop.f32.mrb[7].mxu0  ;;  %v490_v23 = vpop.f32.mrb[7].mxu1 }
 0x165   : > { %v520_v24 = vrot.slane %v519_v12, 1  ;;  %v548_v25 = vrot.slane %v547_v13, 1  ;;  %v525_v26 = vrot.slane %v524_v14, 2  ;;  %v553_v27 = vrot.slane %v552_v15, 2 }
 0x166   : > { %v530_v28 = vrot.slane %v529_v18, 4  ;;  %v558_v29 = vrot.slane %v557_v19, 4  ;;  %v505_v30 = vmul.f32 %v450_v22, %v303_v39  ;;  %v513_v31 = vmul.f32 %v490_v23, %v303_v39 }
 0x167   : > { %v521_v32 = vadd.f32 %v520_v24, %v519_v12  ;;  %v549_v33 = vadd.f32 %v548_v25, %v547_v13  ;;  %v526_v34 = vadd.f32 %v525_v26, %v524_v14  ;;  %v554_v35 = vadd.f32 %v553_v27, %v552_v15 }
 0x168   : > { %v531_v36 = vadd.f32 %v530_v28, %v529_v18  ;;  %v559_v37 = vadd.f32 %v558_v29, %v557_v19  ;;  %v536_v40 = vadd.f32 %v506_v20, %v505_v30  ;;  %v564_v41 = vadd.f32 %v514_v21, %v513_v31 }
 0x169   : > { %571 = vst [vmem:[%s1467_s0] sm:$0x1] %v521_v32  ;;  %575 = vst [vmem:[%s1467_s0 + $0x4] sm:$0x1] %v549_v33  ;;  %v527_v38 = vrot.slane %v526_v34, 1  ;;  %v555_v39 = vrot.slane %v554_v35, 1 }
 0x16a   : > { %v532_v42 = vrot.slane %v531_v36, 2  ;;  %v560_v43 = vrot.slane %v559_v37, 2  ;;  %v537_v44 = vrot.slane %v536_v40, 4  ;;  %v565_v45 = vrot.slane %v564_v41, 4 }
 0x16b   : > { %v528_v46 = vadd.f32 %v527_v38, %v526_v34  ;;  %v556_v47 = vadd.f32 %v555_v39, %v554_v35 }
 0x16c   : > { %v533_v48 = vadd.f32 %v532_v42, %v531_v36  ;;  %v561_v49 = vadd.f32 %v560_v43, %v559_v37  ;;  %v538_v50 = vadd.f32 %v537_v44, %v536_v40  ;;  %v566_v51 = vadd.f32 %v565_v45, %v564_v41 }
 0x16d   : > { %572 = vst [vmem:[%s1467_s0 + $0x1] sm:$0x1] %v528_v46  ;;  %576 = vst [vmem:[%s1467_s0 + $0x5] sm:$0x1] %v556_v47 }
 0x16e   : > { %v534_v52 = vrot.slane %v533_v48, 1  ;;  %v562_v53 = vrot.slane %v561_v49, 1  ;;  %v539_v54 = vrot.slane %v538_v50, 2  ;;  %v567_v55 = vrot.slane %v566_v51, 2 }
 0x170   : > { %v535_v56 = vadd.f32 %v534_v52, %v533_v48  ;;  %v563_v57 = vadd.f32 %v562_v53, %v561_v49  ;;  %v540_v58 = vadd.f32 %v539_v54, %v538_v50  ;;  %v568_v59 = vadd.f32 %v567_v55, %v566_v51 }
 0x172   : > { %573 = vst [vmem:[%s1467_s0 + $0x2] sm:$0x1] %v535_v56  ;;  %577 = vst [vmem:[%s1467_s0 + $0x6] sm:$0x1] %v563_v57  ;;  %v541_v60 = vrot.slane %v540_v58, 1  ;;  %v569_v61 = vrot.slane %v568_v59, 1 }
 0x174   : > { %v542_v62 = vadd.f32 %v541_v60, %v540_v58  ;;  %v570_v63 = vadd.f32 %v569_v61, %v568_v59 }
 0x176   : > { %574 = vst [vmem:[%s1467_s0 + $0x3] sm:$0x1] %v542_v62  ;;  %578 = vst [vmem:[%s1467_s0 + $0x7] sm:$0x1] %v570_v63 }
 0x177   : > { %1010 = shalt.err (!%p1007_p10)
}
 0x178   : > { %s1011_s23 = scalar_lea.hbm %s1483_s29, 128  ;;  %s1015_s18 = scalar_lea.hbm %s1568_s3, 512 }
 0x179   : > { %p1012_p6 = scmp.ne.s32.totalorder %s1483_s29, %s1011_s23  ;;  %p1016_p13 = scmp.lt.u32.totalorder %s1483_s29, %s1568_s3 }
 0x17a   : > { %p1017_p11 = scmp.lt.u32.totalorder %s1015_s18, %s1011_s23  ;;  %p1019_p5 = scmp.lt.u32.totalorder %s1011_s23, %s1483_s29 }
 0x17b   : > { %p1013_p4 = pnand %p1012_p6, %p1600_p12 }
 0x17c   : > { %p1018_p1 = por %p1017_p11, %p1016_p13 }
 0x17d   : > { %p1014_p3 = pneg %p1013_p4 }
 0x17e   : > { %p1020_p7 = por %p1019_p5, %p1018_p1 }
 0x180   : > { %p1021_p0 = pnand %p1020_p7, %p1014_p3 }
 0x182   : > { %1024 = shalt.err (!%p1021_p0)
}
 0x183   : > { %s1154_s24 = smov 16   ;;  %s1155_s10 = smov 32  }
 0x184   : > { %s1156_s22 = smov 1  }
 0x185   : > { %805 = dma.vmem_to_hbm [thread:$0]  (%p1600_p12), %s1476_s8, 128, %s1483_s29, %s1489_s30, %s1154_s24, %s1155_s10, %s1156_s22  }
 0x186 PF: > { %p819_p2 = scmp.ge.s32.totalorder %s1147_s25, 2  ;;  %s610_s21 = sand.u32 1, %s1095_s12  }
 0x187   : > { %p1601_p9 = scmp.ne.s32.totalorder %s1591_s4, 0  ;;  %s611_s5 = scalar_lea.sflag [#allocation4], %s610_s21 }
 0x189   : > { %p815_p8 = pnand %p819_p2, %p1601_p9 }
 0x18b   : > { %1090 = dma.done.wait (!%p815_p8), %s611_s5, 128  }
 0x18c   : > { %1092 = vsyncadd (!%p815_p8), %s611_s5, 4294967168  ;;  %s22_s25 = sadd.s32 1, %s1147_s25   ;;  %s1603_s9 = sld [smem:[#allocation17_spill]] }
 0x18d   : > { %p1518_p10 = scmp.ge.s32.totalorder %s22_s25, 6   ;;  %s1604_s8 = sld [smem:[#allocation11_spill]] }
 0x18e   : > { %s1605_s20 = sld [smem:[#allocation16_spill]]  ;;  %s1606_s21 = sld [smem:[#allocation12_spill]] }
 0x18f   : > { %s1607_s22 = sld [smem:[#allocation13_spill]]  ;;  %s1608_s23 = sld [smem:[#allocation14_spill]] }
 0x190   : > { %s1609_s24 = sld [smem:[#allocation15_spill]]  ;;  %s1610_s12 = smov %s1099_s13 }
 0x191   : > { %s1611_s13 = smov %s1103_s14  ;;  %s1612_s14 = smov %s1304_s15 }
 0x192   : > { %s1613_s15 = smov %s1111_s16  ;;  %s1614_s16 = smov %s1115_s17 }
 0x193   : > { %s1615_s17 = smov %s1603_s9  ;;  %s1616_s18 = smov %s1123_s19 }
 0x194   : > { %s1617_s19 = smov %s1604_s8  ;;  %21 = sbr.rel (!%p1518_p10) target bundleno = 14 (0xe), region = 93 }
 0x19b   :  { %616 = vsyncpa [#allocation3], 1 }
 0x19c   :  { %618 = vsyncpa [#allocation3 + $0x1], 1 }
 0x19d   :  { %619 = vsyncpa [#allocation6], 1 }
 0x19e   :  { %621 = vsyncpa [#allocation6 + $0x1], 1 }
 0x19f   :  { %622 = vsyncpa [#allocation4], 1 }
 0x1a0   :  { %624 = vsyncpa [#allocation4 + $0x1], 1 }

</bundles_post_ra>
